<compile_context>
chip_gen: v5e
topology: v5e:2x2
jax: 0.10.0
libtpu: 0.0.40
codegen_flags: <defaults>
</compile_context>

<pallas_src>
import functools

import numpy as np
import jax
import jax.numpy as jnp
from jax.experimental import pallas as pl
from jax.experimental.pallas import tpu as pltpu


def _gaussian_weights(kernel_size: int):
    """torchvision gaussian_blur 1-D kernel; sigma re-derived from kernel_size."""
    sigma = 0.3 * ((kernel_size - 1) * 0.5 - 1) + 0.8
    half = (kernel_size - 1) * 0.5
    xs = np.linspace(-half, half, kernel_size)
    pdf = np.exp(-0.5 * (xs / sigma) ** 2)
    w = (pdf / pdf.sum()).astype(np.float32)
    return tuple(float(v) for v in w)


# ---------------------------------------------------------------------------
# Stage 1: difference of Gaussians + per-plane min/max, one padded plane/step.
# ---------------------------------------------------------------------------
def _dog_kernel(xp_ref, dog_ref, min_ref, max_ref, *,
                w_low, w_high, r_low, r_high, pad, H, W):
    def sep_blur(w, r):
        taps = 2 * r + 1
        n_rows = H + 2 * r            # rows needed by the vertical pass
        row0 = pad - r
        # Horizontal pass: statically unrolled taps, static pl.ds loads.
        acc_h = w[0] * xp_ref[pl.ds(row0, n_rows), pl.ds(pad - r, W)]
        for k in range(1, taps):
            acc_h = acc_h + w[k] * xp_ref[pl.ds(row0, n_rows), pl.ds(pad - r + k, W)]
        # Vertical pass.
        acc_v = w[0] * acc_h[0:H, :]
        for k in range(1, taps):
            acc_v = acc_v + w[k] * acc_h[k:k + H, :]
        return acc_v

    d = sep_blur(w_low, r_low) - sep_blur(w_high, r_high)
    dog_ref[...] = d
    # Per-plane min/max so the global reduction does not re-read DoG from HBM.
    min_ref[...] = jnp.min(d, keepdims=True)
    max_ref[...] = jnp.max(d, keepdims=True)


# ---------------------------------------------------------------------------
# Stage 2: normalize to [0,1] + adjust_gamma, lane-dense elementwise.
# ---------------------------------------------------------------------------
def _norm_gamma_kernel(scal_ref, dog_ref, out_ref, *, gamma, gain):
    gmin = scal_ref[0]
    inv_range = scal_ref[1]                          # 1 / (gmax - gmin), host-side
    xn = (dog_ref[...] - gmin) * inv_range           # normalize_in_range(x, 0, 1)
    if gamma == 1.0:
        y = xn * gain
    else:
        y = gain * jnp.power(xn, jnp.float32(gamma))
    out_ref[...] = jnp.clip(y, 0.0, 1.0)             # TF.adjust_gamma clamps [0,1]


def concat_dog_forward(t, kernel_low, kernel_high, gamma=1.0, gain=1.0):
    x = t[0]
    if x.ndim == 3:
        x4 = x[:, None, :, :]   # torch.stack(dim=1) on 3-D == cat(dim=1) after C=1 lift
    elif x.ndim == 4:
        x4 = x
    else:
        raise ValueError(f"expected 3-D or 4-D input, got ndim={x.ndim}")

    B, C, H, W = x4.shape
    N = B * C
    r_low, r_high = kernel_low // 2, kernel_high // 2
    R = max(r_low, r_high)
    w_low = _gaussian_weights(kernel_low)
    w_high = _gaussian_weights(kernel_high)

    xf = x4.astype(jnp.float32)
    # TODO(synk): reflect padding left to XLA (no clean Pallas gather for the
    # reflect halo); it is a single cheap data-movement pass.
    xp = jnp.pad(xf, ((0, 0), (0, 0), (R, R), (R, R)), mode="reflect")
    Hp, Wp = H + 2 * R, W + 2 * R
    xp = xp.reshape(N, Hp, Wp)

    dog, mins, maxs = pl.pallas_call(
        functools.partial(_dog_kernel, w_low=w_low, w_high=w_high,
                          r_low=r_low, r_high=r_high, pad=R, H=H, W=W),
        out_shape=(jax.ShapeDtypeStruct((N, H, W), jnp.float32),
                   jax.ShapeDtypeStruct((N, 1, 1), jnp.float32),
                   jax.ShapeDtypeStruct((N, 1, 1), jnp.float32)),
        grid=(N,),
        in_specs=[pl.BlockSpec((None, Hp, Wp), lambda n: (n, 0, 0))],
        out_specs=[pl.BlockSpec((None, H, W), lambda n: (n, 0, 0)),
                   pl.BlockSpec((None, 1, 1), lambda n: (n, 0, 0)),
                   pl.BlockSpec((None, 1, 1), lambda n: (n, 0, 0))],
        compiler_params=pltpu.CompilerParams(dimension_semantics=("parallel",)),
    )(xp)

    # Tiny N-scalar reduction (cross-plane dependency) + scalar prep in XLA.
    gmin = jnp.min(mins)
    gmax = jnp.max(maxs)
    inv_range = jnp.float32(1.0) / (gmax - gmin)
    scal = jnp.stack([gmin, inv_range]).astype(jnp.float32)

    # Lane-dense flatten: present a (rows, 128) slab so stores are full-lane.
    LANES = 128
    total = N * H * W
    rows = -(-total // LANES)
    tile_r = min(2048, rows)                  # 2048x128 f32 = 1 MiB per buffer
    grid_r = -(-rows // tile_r)
    padded_rows = grid_r * tile_r
    flat = dog.reshape(-1)
    pad_amt = padded_rows * LANES - total
    if pad_amt:
        flat = jnp.pad(flat, (0, pad_amt))
    dog2d = flat.reshape(padded_rows, LANES)

    x2_2d = pl.pallas_call(
        functools.partial(_norm_gamma_kernel, gamma=float(gamma), gain=float(gain)),
        out_shape=jax.ShapeDtypeStruct((padded_rows, LANES), jnp.float32),
        grid=(grid_r,),
        in_specs=[
            pl.BlockSpec(memory_space=pltpu.MemorySpace.SMEM),   # [gmin, 1/range]
            pl.BlockSpec((tile_r, LANES), lambda i: (i, 0)),
        ],
        out_specs=pl.BlockSpec((tile_r, LANES), lambda i: (i, 0)),
        compiler_params=pltpu.CompilerParams(dimension_semantics=("parallel",)),
    )(scal, dog2d)

    x2 = x2_2d.reshape(-1)[:total].reshape(B, C, H, W).astype(x4.dtype)
    # TODO(synk): channel concat is pure data movement; left to XLA.
    out = jnp.concatenate([x4, x2], axis=1)   # (B, 2C, H, W); == stack for 3-D input

    l = list(t)
    l[0] = out
    return tuple(l)


class ConcatDoG:
    """JAX/Pallas equivalent of the PyTorch ConcatDoG module."""

    def __init__(self, low_sigma, high_sigma, truncate=4.0, gamma=1.0, gain=1.0):
        radius_low = round(truncate * low_sigma)
        radius_high = round(truncate * high_sigma)
        self.kernel_low = 2 * radius_low + 1
        self.kernel_high = 2 * radius_high + 1
        self.gamma = gamma
        self.gain = gain

    def __call__(self, t):
        return concat_dog_forward(t, self.kernel_low, self.kernel_high,
                                  gamma=self.gamma, gain=self.gain)


# ---------------------------------------------------------------------------
# Pure-jnp reference mirroring the torchvision semantics (separable blur).
# ---------------------------------------------------------------------------
def _reference_concat_dog(x4, kernel_low, kernel_high, gamma, gain):
    def blur(img, ks):
        w = _gaussian_weights(ks)
        r = ks // 2
        _, _, H, W = img.shape
        xp = jnp.pad(img, ((0, 0), (0, 0), (r, r), (r, r)), mode="reflect")
        acc_h = w[0] * xp[:, :, :, 0:W]
        for k in range(1, ks):
            acc_h = acc_h + w[k] * xp[:, :, :, k:k + W]
        acc_v = w[0] * acc_h[:, :, 0:H, :]
        for k in range(1, ks):
            acc_v = acc_v + w[k] * acc_h[:, :, k:k + H, :]
        return acc_v

    d = blur(x4, kernel_low) - blur(x4, kernel_high)
    dn = (d - jnp.min(d)) / (jnp.max(d) - jnp.min(d))
    x2 = dn * gain if gamma == 1.0 else gain * jnp.power(dn, gamma)
    x2 = jnp.clip(x2, 0.0, 1.0)
    return jnp.concatenate([x4, x2], axis=1)


if __name__ == "__main__":
    low_sigma, high_sigma = 1.0, 1.6            # -> kernel sizes 9 and 13
    module = ConcatDoG(low_sigma, high_sigma, truncate=4.0, gamma=1.0, gain=1.0)

    key = jax.random.PRNGKey(0)
    kx, ky = jax.random.split(key)
    # Small OCT-style pair: NCHW image + pass-through target.
    x = jax.random.uniform(kx, (2, 2, 16, 16), dtype=jnp.float32)
    y = jax.random.uniform(ky, (2, 16, 16), dtype=jnp.float32)

    out = module((x, y))
    jax.block_until_ready(out)

    ref = _reference_concat_dog(x, module.kernel_low, module.kernel_high,
                                module.gamma, module.gain)

    assert out[0].shape == (2, 4, 16, 16)
    assert out[0].dtype == x.dtype
    assert bool(jnp.all(out[1] == y))            # other tuple elements untouched
    assert bool(jnp.all(out[0][:, :2] == x))     # original channels pass through
    assert bool(jnp.allclose(out[0], ref, atol=1e-5, rtol=1e-5))
    print("KERNEL_OK")
</pallas_src>

<mosaic_0001>
module attributes {stable_mosaic.version = 11 : i64} {
  func.func @_dog_kernel(%arg0: i32, %arg1: memref<1x28x28xf32, #tpu.memory_space<vmem>>, %arg2: memref<1x16x16xf32, #tpu.memory_space<vmem>>, %arg3: memref<1x1x1xf32, #tpu.memory_space<vmem>>, %arg4: memref<1x1x1xf32, #tpu.memory_space<vmem>>) attributes {dimension_semantics = [#tpu.dimension_semantics<parallel>], iteration_bounds = array<i64: 4>, scalar_prefetch = 0 : i64, scratch_operands = 0 : i64, tpu.core_type = #tpu.core_type<tc>, window_params = [{transform_indices = @transform_0, window_bounds = array<i64: 1, 28, 28>}, {transform_indices = @transform_1, window_bounds = array<i64: 1, 16, 16>}, {transform_indices = @transform_2, window_bounds = array<i64: 1, 1, 1>}, {transform_indices = @transform_3, window_bounds = array<i64: 1, 1, 1>}]} {
    %c0 = arith.constant 0 : index
    %c2 = arith.constant 2 : index
    %c2_0 = arith.constant 2 : index
    %0 = vector.load %arg1[%c0, %c2, %c2_0] : memref<1x28x28xf32, #tpu.memory_space<vmem>>, vector<1x24x16xf32>
    %1 = vector.shape_cast %0 : vector<1x24x16xf32> to vector<24x16xf32>
    %cst = arith.constant 0.0148394536 : f32
    %2 = vector.broadcast %cst : f32 to vector<24x16xf32>
    %3 = arith.mulf %2, %1 : vector<24x16xf32>
    %c0_1 = arith.constant 0 : index
    %c2_2 = arith.constant 2 : index
    %c3 = arith.constant 3 : index
    %4 = vector.load %arg1[%c0_1, %c2_2, %c3] : memref<1x28x28xf32, #tpu.memory_space<vmem>>, vector<1x24x16xf32>
    %5 = vector.shape_cast %4 : vector<1x24x16xf32> to vector<24x16xf32>
    %cst_3 = arith.constant 0.0498172902 : f32
    %6 = vector.broadcast %cst_3 : f32 to vector<24x16xf32>
    %7 = arith.mulf %6, %5 : vector<24x16xf32>
    %8 = arith.addf %3, %7 : vector<24x16xf32>
    %c0_4 = arith.constant 0 : index
    %c2_5 = arith.constant 2 : index
    %c4 = arith.constant 4 : index
    %9 = vector.load %arg1[%c0_4, %c2_5, %c4] : memref<1x28x28xf32, #tpu.memory_space<vmem>>, vector<1x24x16xf32>
    %10 = vector.shape_cast %9 : vector<1x24x16xf32> to vector<24x16xf32>
    %cst_6 = arith.constant 0.118322507 : f32
    %11 = vector.broadcast %cst_6 : f32 to vector<24x16xf32>
    %12 = arith.mulf %11, %10 : vector<24x16xf32>
    %13 = arith.addf %8, %12 : vector<24x16xf32>
    %c0_7 = arith.constant 0 : index
    %c2_8 = arith.constant 2 : index
    %c5 = arith.constant 5 : index
    %14 = vector.load %arg1[%c0_7, %c2_8, %c5] : memref<1x28x28xf32, #tpu.memory_space<vmem>>, vector<1x24x16xf32>
    %15 = vector.shape_cast %14 : vector<1x24x16xf32> to vector<24x16xf32>
    %cst_9 = arith.constant 1.988290e-01 : f32
    %16 = vector.broadcast %cst_9 : f32 to vector<24x16xf32>
    %17 = arith.mulf %16, %15 : vector<24x16xf32>
    %18 = arith.addf %13, %17 : vector<24x16xf32>
    %c0_10 = arith.constant 0 : index
    %c2_11 = arith.constant 2 : index
    %c6 = arith.constant 6 : index
    %19 = vector.load %arg1[%c0_10, %c2_11, %c6] : memref<1x28x28xf32, #tpu.memory_space<vmem>>, vector<1x24x16xf32>
    %20 = vector.shape_cast %19 : vector<1x24x16xf32> to vector<24x16xf32>
    %cst_12 = arith.constant 0.236383513 : f32
    %21 = vector.broadcast %cst_12 : f32 to vector<24x16xf32>
    %22 = arith.mulf %21, %20 : vector<24x16xf32>
    %23 = arith.addf %18, %22 : vector<24x16xf32>
    %c0_13 = arith.constant 0 : index
    %c2_14 = arith.constant 2 : index
    %c7 = arith.constant 7 : index
    %24 = vector.load %arg1[%c0_13, %c2_14, %c7] : memref<1x28x28xf32, #tpu.memory_space<vmem>>, vector<1x24x16xf32>
    %25 = vector.shape_cast %24 : vector<1x24x16xf32> to vector<24x16xf32>
    %cst_15 = arith.constant 1.988290e-01 : f32
    %26 = vector.broadcast %cst_15 : f32 to vector<24x16xf32>
    %27 = arith.mulf %26, %25 : vector<24x16xf32>
    %28 = arith.addf %23, %27 : vector<24x16xf32>
    %c0_16 = arith.constant 0 : index
    %c2_17 = arith.constant 2 : index
    %c8 = arith.constant 8 : index
    %29 = vector.load %arg1[%c0_16, %c2_17, %c8] : memref<1x28x28xf32, #tpu.memory_space<vmem>>, vector<1x24x16xf32>
    %30 = vector.shape_cast %29 : vector<1x24x16xf32> to vector<24x16xf32>
    %cst_18 = arith.constant 0.118322507 : f32
    %31 = vector.broadcast %cst_18 : f32 to vector<24x16xf32>
    %32 = arith.mulf %31, %30 : vector<24x16xf32>
    %33 = arith.addf %28, %32 : vector<24x16xf32>
    %c0_19 = arith.constant 0 : index
    %c2_20 = arith.constant 2 : index
    %c9 = arith.constant 9 : index
    %34 = vector.load %arg1[%c0_19, %c2_20, %c9] : memref<1x28x28xf32, #tpu.memory_space<vmem>>, vector<1x24x16xf32>
    %35 = vector.shape_cast %34 : vector<1x24x16xf32> to vector<24x16xf32>
    %cst_21 = arith.constant 0.0498172902 : f32
    %36 = vector.broadcast %cst_21 : f32 to vector<24x16xf32>
    %37 = arith.mulf %36, %35 : vector<24x16xf32>
    %38 = arith.addf %33, %37 : vector<24x16xf32>
    %c0_22 = arith.constant 0 : index
    %c2_23 = arith.constant 2 : index
    %c10 = arith.constant 10 : index
    %39 = vector.load %arg1[%c0_22, %c2_23, %c10] : memref<1x28x28xf32, #tpu.memory_space<vmem>>, vector<1x24x16xf32>
    %40 = vector.shape_cast %39 : vector<1x24x16xf32> to vector<24x16xf32>
    %cst_24 = arith.constant 0.0148394536 : f32
    %41 = vector.broadcast %cst_24 : f32 to vector<24x16xf32>
    %42 = arith.mulf %41, %40 : vector<24x16xf32>
    %43 = arith.addf %38, %42 : vector<24x16xf32>
    %44 = vector.extract_strided_slice %43 {offsets = [0, 0], sizes = [16, 16], strides = [1, 1]} : vector<24x16xf32> to vector<16x16xf32>
    %cst_25 = arith.constant 0.0148394536 : f32
    %45 = vector.broadcast %cst_25 : f32 to vector<16x16xf32>
    %46 = arith.mulf %45, %44 : vector<16x16xf32>
    %47 = vector.extract_strided_slice %43 {offsets = [1, 0], sizes = [16, 16], strides = [1, 1]} : vector<24x16xf32> to vector<16x16xf32>
    %cst_26 = arith.constant 0.0498172902 : f32
    %48 = vector.broadcast %cst_26 : f32 to vector<16x16xf32>
    %49 = arith.mulf %48, %47 : vector<16x16xf32>
    %50 = arith.addf %46, %49 : vector<16x16xf32>
    %51 = vector.extract_strided_slice %43 {offsets = [2, 0], sizes = [16, 16], strides = [1, 1]} : vector<24x16xf32> to vector<16x16xf32>
    %cst_27 = arith.constant 0.118322507 : f32
    %52 = vector.broadcast %cst_27 : f32 to vector<16x16xf32>
    %53 = arith.mulf %52, %51 : vector<16x16xf32>
    %54 = arith.addf %50, %53 : vector<16x16xf32>
    %55 = vector.extract_strided_slice %43 {offsets = [3, 0], sizes = [16, 16], strides = [1, 1]} : vector<24x16xf32> to vector<16x16xf32>
    %cst_28 = arith.constant 1.988290e-01 : f32
    %56 = vector.broadcast %cst_28 : f32 to vector<16x16xf32>
    %57 = arith.mulf %56, %55 : vector<16x16xf32>
    %58 = arith.addf %54, %57 : vector<16x16xf32>
    %59 = vector.extract_strided_slice %43 {offsets = [4, 0], sizes = [16, 16], strides = [1, 1]} : vector<24x16xf32> to vector<16x16xf32>
    %cst_29 = arith.constant 0.236383513 : f32
    %60 = vector.broadcast %cst_29 : f32 to vector<16x16xf32>
    %61 = arith.mulf %60, %59 : vector<16x16xf32>
    %62 = arith.addf %58, %61 : vector<16x16xf32>
    %63 = vector.extract_strided_slice %43 {offsets = [5, 0], sizes = [16, 16], strides = [1, 1]} : vector<24x16xf32> to vector<16x16xf32>
    %cst_30 = arith.constant 1.988290e-01 : f32
    %64 = vector.broadcast %cst_30 : f32 to vector<16x16xf32>
    %65 = arith.mulf %64, %63 : vector<16x16xf32>
    %66 = arith.addf %62, %65 : vector<16x16xf32>
    %67 = vector.extract_strided_slice %43 {offsets = [6, 0], sizes = [16, 16], strides = [1, 1]} : vector<24x16xf32> to vector<16x16xf32>
    %cst_31 = arith.constant 0.118322507 : f32
    %68 = vector.broadcast %cst_31 : f32 to vector<16x16xf32>
    %69 = arith.mulf %68, %67 : vector<16x16xf32>
    %70 = arith.addf %66, %69 : vector<16x16xf32>
    %71 = vector.extract_strided_slice %43 {offsets = [7, 0], sizes = [16, 16], strides = [1, 1]} : vector<24x16xf32> to vector<16x16xf32>
    %cst_32 = arith.constant 0.0498172902 : f32
    %72 = vector.broadcast %cst_32 : f32 to vector<16x16xf32>
    %73 = arith.mulf %72, %71 : vector<16x16xf32>
    %74 = arith.addf %70, %73 : vector<16x16xf32>
    %75 = vector.extract_strided_slice %43 {offsets = [8, 0], sizes = [16, 16], strides = [1, 1]} : vector<24x16xf32> to vector<16x16xf32>
    %cst_33 = arith.constant 0.0148394536 : f32
    %76 = vector.broadcast %cst_33 : f32 to vector<16x16xf32>
    %77 = arith.mulf %76, %75 : vector<16x16xf32>
    %78 = arith.addf %74, %77 : vector<16x16xf32>
    %c0_34 = arith.constant 0 : index
    %c0_35 = arith.constant 0 : index
    %c0_36 = arith.constant 0 : index
    %79 = vector.load %arg1[%c0_34, %c0_35, %c0_36] : memref<1x28x28xf32, #tpu.memory_space<vmem>>, vector<1x28x16xf32>
    %80 = vector.shape_cast %79 : vector<1x28x16xf32> to vector<28x16xf32>
    %cst_37 = arith.constant 0.00579887768 : f32
    %81 = vector.broadcast %cst_37 : f32 to vector<28x16xf32>
    %82 = arith.mulf %81, %80 : vector<28x16xf32>
    %c0_38 = arith.constant 0 : index
    %c0_39 = arith.constant 0 : index
    %c1 = arith.constant 1 : index
    %83 = vector.load %arg1[%c0_38, %c0_39, %c1] : memref<1x28x28xf32, #tpu.memory_space<vmem>>, vector<1x28x16xf32>
    %84 = vector.shape_cast %83 : vector<1x28x16xf32> to vector<28x16xf32>
    %cst_40 = arith.constant 0.0164013226 : f32
    %85 = vector.broadcast %cst_40 : f32 to vector<28x16xf32>
    %86 = arith.mulf %85, %84 : vector<28x16xf32>
    %87 = arith.addf %82, %86 : vector<28x16xf32>
    %c0_41 = arith.constant 0 : index
    %c0_42 = arith.constant 0 : index
    %c2_43 = arith.constant 2 : index
    %88 = vector.load %arg1[%c0_41, %c0_42, %c2_43] : memref<1x28x28xf32, #tpu.memory_space<vmem>>, vector<1x28x16xf32>
    %89 = vector.shape_cast %88 : vector<1x28x16xf32> to vector<28x16xf32>
    %cst_44 = arith.constant 0.038398698 : f32
    %90 = vector.broadcast %cst_44 : f32 to vector<28x16xf32>
    %91 = arith.mulf %90, %89 : vector<28x16xf32>
    %92 = arith.addf %87, %91 : vector<28x16xf32>
    %c0_45 = arith.constant 0 : index
    %c0_46 = arith.constant 0 : index
    %c3_47 = arith.constant 3 : index
    %93 = vector.load %arg1[%c0_45, %c0_46, %c3_47] : memref<1x28x28xf32, #tpu.memory_space<vmem>>, vector<1x28x16xf32>
    %94 = vector.shape_cast %93 : vector<1x28x16xf32> to vector<28x16xf32>
    %cst_48 = arith.constant 0.0744143873 : f32
    %95 = vector.broadcast %cst_48 : f32 to vector<28x16xf32>
    %96 = arith.mulf %95, %94 : vector<28x16xf32>
    %97 = arith.addf %92, %96 : vector<28x16xf32>
    %c0_49 = arith.constant 0 : index
    %c0_50 = arith.constant 0 : index
    %c4_51 = arith.constant 4 : index
    %98 = vector.load %arg1[%c0_49, %c0_50, %c4_51] : memref<1x28x28xf32, #tpu.memory_space<vmem>>, vector<1x28x16xf32>
    %99 = vector.shape_cast %98 : vector<1x28x16xf32> to vector<28x16xf32>
    %cst_52 = arith.constant 0.119371332 : f32
    %100 = vector.broadcast %cst_52 : f32 to vector<28x16xf32>
    %101 = arith.mulf %100, %99 : vector<28x16xf32>
    %102 = arith.addf %97, %101 : vector<28x16xf32>
    %c0_53 = arith.constant 0 : index
    %c0_54 = arith.constant 0 : index
    %c5_55 = arith.constant 5 : index
    %103 = vector.load %arg1[%c0_53, %c0_54, %c5_55] : memref<1x28x28xf32, #tpu.memory_space<vmem>>, vector<1x28x16xf32>
    %104 = vector.shape_cast %103 : vector<1x28x16xf32> to vector<28x16xf32>
    %cst_56 = arith.constant 0.158506081 : f32
    %105 = vector.broadcast %cst_56 : f32 to vector<28x16xf32>
    %106 = arith.mulf %105, %104 : vector<28x16xf32>
    %107 = arith.addf %102, %106 : vector<28x16xf32>
    %c0_57 = arith.constant 0 : index
    %c0_58 = arith.constant 0 : index
    %c6_59 = arith.constant 6 : index
    %108 = vector.load %arg1[%c0_57, %c0_58, %c6_59] : memref<1x28x28xf32, #tpu.memory_space<vmem>>, vector<1x28x16xf32>
    %109 = vector.shape_cast %108 : vector<1x28x16xf32> to vector<28x16xf32>
    %cst_60 = arith.constant 0.17421861 : f32
    %110 = vector.broadcast %cst_60 : f32 to vector<28x16xf32>
    %111 = arith.mulf %110, %109 : vector<28x16xf32>
    %112 = arith.addf %107, %111 : vector<28x16xf32>
    %c0_61 = arith.constant 0 : index
    %c0_62 = arith.constant 0 : index
    %c7_63 = arith.constant 7 : index
    %113 = vector.load %arg1[%c0_61, %c0_62, %c7_63] : memref<1x28x28xf32, #tpu.memory_space<vmem>>, vector<1x28x16xf32>
    %114 = vector.shape_cast %113 : vector<1x28x16xf32> to vector<28x16xf32>
    %cst_64 = arith.constant 0.158506081 : f32
    %115 = vector.broadcast %cst_64 : f32 to vector<28x16xf32>
    %116 = arith.mulf %115, %114 : vector<28x16xf32>
    %117 = arith.addf %112, %116 : vector<28x16xf32>
    %c0_65 = arith.constant 0 : index
    %c0_66 = arith.constant 0 : index
    %c8_67 = arith.constant 8 : index
    %118 = vector.load %arg1[%c0_65, %c0_66, %c8_67] : memref<1x28x28xf32, #tpu.memory_space<vmem>>, vector<1x28x16xf32>
    %119 = vector.shape_cast %118 : vector<1x28x16xf32> to vector<28x16xf32>
    %cst_68 = arith.constant 0.119371332 : f32
    %120 = vector.broadcast %cst_68 : f32 to vector<28x16xf32>
    %121 = arith.mulf %120, %119 : vector<28x16xf32>
    %122 = arith.addf %117, %121 : vector<28x16xf32>
    %c0_69 = arith.constant 0 : index
    %c0_70 = arith.constant 0 : index
    %c9_71 = arith.constant 9 : index
    %123 = vector.load %arg1[%c0_69, %c0_70, %c9_71] : memref<1x28x28xf32, #tpu.memory_space<vmem>>, vector<1x28x16xf32>
    %124 = vector.shape_cast %123 : vector<1x28x16xf32> to vector<28x16xf32>
    %cst_72 = arith.constant 0.0744143873 : f32
    %125 = vector.broadcast %cst_72 : f32 to vector<28x16xf32>
    %126 = arith.mulf %125, %124 : vector<28x16xf32>
    %127 = arith.addf %122, %126 : vector<28x16xf32>
    %c0_73 = arith.constant 0 : index
    %c0_74 = arith.constant 0 : index
    %c10_75 = arith.constant 10 : index
    %128 = vector.load %arg1[%c0_73, %c0_74, %c10_75] : memref<1x28x28xf32, #tpu.memory_space<vmem>>, vector<1x28x16xf32>
    %129 = vector.shape_cast %128 : vector<1x28x16xf32> to vector<28x16xf32>
    %cst_76 = arith.constant 0.038398698 : f32
    %130 = vector.broadcast %cst_76 : f32 to vector<28x16xf32>
    %131 = arith.mulf %130, %129 : vector<28x16xf32>
    %132 = arith.addf %127, %131 : vector<28x16xf32>
    %c0_77 = arith.constant 0 : index
    %c0_78 = arith.constant 0 : index
    %c11 = arith.constant 11 : index
    %133 = vector.load %arg1[%c0_77, %c0_78, %c11] : memref<1x28x28xf32, #tpu.memory_space<vmem>>, vector<1x28x16xf32>
    %134 = vector.shape_cast %133 : vector<1x28x16xf32> to vector<28x16xf32>
    %cst_79 = arith.constant 0.0164013226 : f32
    %135 = vector.broadcast %cst_79 : f32 to vector<28x16xf32>
    %136 = arith.mulf %135, %134 : vector<28x16xf32>
    %137 = arith.addf %132, %136 : vector<28x16xf32>
    %c0_80 = arith.constant 0 : index
    %c0_81 = arith.constant 0 : index
    %c12 = arith.constant 12 : index
    %138 = vector.load %arg1[%c0_80, %c0_81, %c12] : memref<1x28x28xf32, #tpu.memory_space<vmem>>, vector<1x28x16xf32>
    %139 = vector.shape_cast %138 : vector<1x28x16xf32> to vector<28x16xf32>
    %cst_82 = arith.constant 0.00579887768 : f32
    %140 = vector.broadcast %cst_82 : f32 to vector<28x16xf32>
    %141 = arith.mulf %140, %139 : vector<28x16xf32>
    %142 = arith.addf %137, %141 : vector<28x16xf32>
    %143 = vector.extract_strided_slice %142 {offsets = [0, 0], sizes = [16, 16], strides = [1, 1]} : vector<28x16xf32> to vector<16x16xf32>
    %cst_83 = arith.constant 0.00579887768 : f32
    %144 = vector.broadcast %cst_83 : f32 to vector<16x16xf32>
    %145 = arith.mulf %144, %143 : vector<16x16xf32>
    %146 = vector.extract_strided_slice %142 {offsets = [1, 0], sizes = [16, 16], strides = [1, 1]} : vector<28x16xf32> to vector<16x16xf32>
    %cst_84 = arith.constant 0.0164013226 : f32
    %147 = vector.broadcast %cst_84 : f32 to vector<16x16xf32>
    %148 = arith.mulf %147, %146 : vector<16x16xf32>
    %149 = arith.addf %145, %148 : vector<16x16xf32>
    %150 = vector.extract_strided_slice %142 {offsets = [2, 0], sizes = [16, 16], strides = [1, 1]} : vector<28x16xf32> to vector<16x16xf32>
    %cst_85 = arith.constant 0.038398698 : f32
    %151 = vector.broadcast %cst_85 : f32 to vector<16x16xf32>
    %152 = arith.mulf %151, %150 : vector<16x16xf32>
    %153 = arith.addf %149, %152 : vector<16x16xf32>
    %154 = vector.extract_strided_slice %142 {offsets = [3, 0], sizes = [16, 16], strides = [1, 1]} : vector<28x16xf32> to vector<16x16xf32>
    %cst_86 = arith.constant 0.0744143873 : f32
    %155 = vector.broadcast %cst_86 : f32 to vector<16x16xf32>
    %156 = arith.mulf %155, %154 : vector<16x16xf32>
    %157 = arith.addf %153, %156 : vector<16x16xf32>
    %158 = vector.extract_strided_slice %142 {offsets = [4, 0], sizes = [16, 16], strides = [1, 1]} : vector<28x16xf32> to vector<16x16xf32>
    %cst_87 = arith.constant 0.119371332 : f32
    %159 = vector.broadcast %cst_87 : f32 to vector<16x16xf32>
    %160 = arith.mulf %159, %158 : vector<16x16xf32>
    %161 = arith.addf %157, %160 : vector<16x16xf32>
    %162 = vector.extract_strided_slice %142 {offsets = [5, 0], sizes = [16, 16], strides = [1, 1]} : vector<28x16xf32> to vector<16x16xf32>
    %cst_88 = arith.constant 0.158506081 : f32
    %163 = vector.broadcast %cst_88 : f32 to vector<16x16xf32>
    %164 = arith.mulf %163, %162 : vector<16x16xf32>
    %165 = arith.addf %161, %164 : vector<16x16xf32>
    %166 = vector.extract_strided_slice %142 {offsets = [6, 0], sizes = [16, 16], strides = [1, 1]} : vector<28x16xf32> to vector<16x16xf32>
    %cst_89 = arith.constant 0.17421861 : f32
    %167 = vector.broadcast %cst_89 : f32 to vector<16x16xf32>
    %168 = arith.mulf %167, %166 : vector<16x16xf32>
    %169 = arith.addf %165, %168 : vector<16x16xf32>
    %170 = vector.extract_strided_slice %142 {offsets = [7, 0], sizes = [16, 16], strides = [1, 1]} : vector<28x16xf32> to vector<16x16xf32>
    %cst_90 = arith.constant 0.158506081 : f32
    %171 = vector.broadcast %cst_90 : f32 to vector<16x16xf32>
    %172 = arith.mulf %171, %170 : vector<16x16xf32>
    %173 = arith.addf %169, %172 : vector<16x16xf32>
    %174 = vector.extract_strided_slice %142 {offsets = [8, 0], sizes = [16, 16], strides = [1, 1]} : vector<28x16xf32> to vector<16x16xf32>
    %cst_91 = arith.constant 0.119371332 : f32
    %175 = vector.broadcast %cst_91 : f32 to vector<16x16xf32>
    %176 = arith.mulf %175, %174 : vector<16x16xf32>
    %177 = arith.addf %173, %176 : vector<16x16xf32>
    %178 = vector.extract_strided_slice %142 {offsets = [9, 0], sizes = [16, 16], strides = [1, 1]} : vector<28x16xf32> to vector<16x16xf32>
    %cst_92 = arith.constant 0.0744143873 : f32
    %179 = vector.broadcast %cst_92 : f32 to vector<16x16xf32>
    %180 = arith.mulf %179, %178 : vector<16x16xf32>
    %181 = arith.addf %177, %180 : vector<16x16xf32>
    %182 = vector.extract_strided_slice %142 {offsets = [10, 0], sizes = [16, 16], strides = [1, 1]} : vector<28x16xf32> to vector<16x16xf32>
    %cst_93 = arith.constant 0.038398698 : f32
    %183 = vector.broadcast %cst_93 : f32 to vector<16x16xf32>
    %184 = arith.mulf %183, %182 : vector<16x16xf32>
    %185 = arith.addf %181, %184 : vector<16x16xf32>
    %186 = vector.extract_strided_slice %142 {offsets = [11, 0], sizes = [16, 16], strides = [1, 1]} : vector<28x16xf32> to vector<16x16xf32>
    %cst_94 = arith.constant 0.0164013226 : f32
    %187 = vector.broadcast %cst_94 : f32 to vector<16x16xf32>
    %188 = arith.mulf %187, %186 : vector<16x16xf32>
    %189 = arith.addf %185, %188 : vector<16x16xf32>
    %190 = vector.extract_strided_slice %142 {offsets = [12, 0], sizes = [16, 16], strides = [1, 1]} : vector<28x16xf32> to vector<16x16xf32>
    %cst_95 = arith.constant 0.00579887768 : f32
    %191 = vector.broadcast %cst_95 : f32 to vector<16x16xf32>
    %192 = arith.mulf %191, %190 : vector<16x16xf32>
    %193 = arith.addf %189, %192 : vector<16x16xf32>
    %194 = arith.subf %78, %193 : vector<16x16xf32>
    %c0_96 = arith.constant 0 : index
    %c0_97 = arith.constant 0 : index
    %c0_98 = arith.constant 0 : index
    %195 = vector.load %arg2[%c0_96, %c0_97, %c0_98] : memref<1x16x16xf32, #tpu.memory_space<vmem>>, vector<1x16x16xf32>
    %196 = vector.shape_cast %195 : vector<1x16x16xf32> to vector<16x16xf32>
    %197 = vector.shape_cast %194 : vector<16x16xf32> to vector<1x16x16xf32>
    tpu.vector_store %arg2[%c0_96, %c0_97, %c0_98], %197 {strides = array<i32>} : memref<1x16x16xf32, #tpu.memory_space<vmem>>, vector<1x16x16xf32>,
    %198 = vector.shape_cast %194 : vector<16x16xf32> to vector<1x16x16xf32>
    %cst_99 = arith.constant dense<0x7F800000> : vector<1xf32>
    %199 = vector.multi_reduction <minimumf>, %198, %cst_99 [1, 2] : vector<1x16x16xf32> to vector<1xf32>
    %200 = vector.shape_cast %199 : vector<1xf32> to vector<1x1x1xf32>
    %201 = vector.extract %200[0, 0, 0] : f32 from vector<1x1x1xf32>
    %202 = vector.broadcast %201 : f32 to vector<1x1xf32>
    %c0_100 = arith.constant 0 : index
    %c0_101 = arith.constant 0 : index
    %c0_102 = arith.constant 0 : index
    %203 = vector.load %arg3[%c0_100, %c0_101, %c0_102] : memref<1x1x1xf32, #tpu.memory_space<vmem>>, vector<1x1x1xf32>
    %204 = vector.shape_cast %203 : vector<1x1x1xf32> to vector<1x1xf32>
    %205 = vector.shape_cast %202 : vector<1x1xf32> to vector<1x1x1xf32>
    tpu.vector_store %arg3[%c0_100, %c0_101, %c0_102], %205 {strides = array<i32>} : memref<1x1x1xf32, #tpu.memory_space<vmem>>, vector<1x1x1xf32>,
    %206 = vector.shape_cast %194 : vector<16x16xf32> to vector<1x16x16xf32>
    %cst_103 = arith.constant dense<0xFF800000> : vector<1xf32>
    %207 = vector.multi_reduction <maximumf>, %206, %cst_103 [1, 2] : vector<1x16x16xf32> to vector<1xf32>
    %208 = vector.shape_cast %207 : vector<1xf32> to vector<1x1x1xf32>
    %209 = vector.extract %208[0, 0, 0] : f32 from vector<1x1x1xf32>
    %210 = vector.broadcast %209 : f32 to vector<1x1xf32>
    %c0_104 = arith.constant 0 : index
    %c0_105 = arith.constant 0 : index
    %c0_106 = arith.constant 0 : index
    %211 = vector.load %arg4[%c0_104, %c0_105, %c0_106] : memref<1x1x1xf32, #tpu.memory_space<vmem>>, vector<1x1x1xf32>
    %212 = vector.shape_cast %211 : vector<1x1x1xf32> to vector<1x1xf32>
    %213 = vector.shape_cast %210 : vector<1x1xf32> to vector<1x1x1xf32>
    tpu.vector_store %arg4[%c0_104, %c0_105, %c0_106], %213 {strides = array<i32>} : memref<1x1x1xf32, #tpu.memory_space<vmem>>, vector<1x1x1xf32>,
    return
  }
  func.func @transform_0(%arg0: i32) -> (i32, i32, i32) {
    %c0_i32 = arith.constant 0 : i32
    %c0_i32_0 = arith.constant 0 : i32
    %c0_i32_1 = arith.constant 0 : i32
    return %arg0, %c0_i32, %c0_i32_0 : i32, i32, i32
  }
  func.func @transform_1(%arg0: i32) -> (i32, i32, i32) {
    %c0_i32 = arith.constant 0 : i32
    %c0_i32_0 = arith.constant 0 : i32
    %c0_i32_1 = arith.constant 0 : i32
    return %arg0, %c0_i32, %c0_i32_0 : i32, i32, i32
  }
  func.func @transform_2(%arg0: i32) -> (i32, i32, i32) {
    %c0_i32 = arith.constant 0 : i32
    %c0_i32_0 = arith.constant 0 : i32
    %c0_i32_1 = arith.constant 0 : i32
    return %arg0, %c0_i32, %c0_i32_0 : i32, i32, i32
  }
  func.func @transform_3(%arg0: i32) -> (i32, i32, i32) {
    %c0_i32 = arith.constant 0 : i32
    %c0_i32_0 = arith.constant 0 : i32
    %c0_i32_1 = arith.constant 0 : i32
    return %arg0, %c0_i32, %c0_i32_0 : i32, i32, i32
  }
}

</mosaic_0001>

<bundles_post_ra>
// kernel: tpu_custom_call.1
= control target key start
LH: loop header
LB: loop body
LE: loop exit
PB: predicated region body
PF: predicated region fallthrough
CT: control target
= control target key end

     0   :  { %9 = vsyncpa [#allocation3], 0  ;;  %s1555_s0 = inlined_call_operand.vmem [shape: f32[4,28,28], index: 0, kind: input, shape index: {}]   ;;  %s1556_s1 = inlined_call_operand.hbm [shape: f32[4,16,16], index: 1, kind: output, shape index: {0}]   ;;  %s1557_s2 = inlined_call_operand.vmem [shape: f32[4,1,1], index: 2, kind: output, shape index: {1}]   ;;  %s1558_s3 = inlined_call_operand.vmem [shape: f32[4,1,1], index: 3, kind: output, shape index: {2}]  }
   0x1   :  { %11 = vsyncpa [#allocation3 + $0x1], 0  ;;  %s1162_s12 = smov 0   ;;  %s1164_s13 = smov 0  }
   0x2   :  { %s1166_s14 = smov 0   ;;  %s1168_s15 = smov 0  }
   0x3 LB: > { %s1183_s16 = sadd.s32 4294967295, %s1125_s15   ;;  %s991_s17 = sadd.s32 4294967294, %s1125_s15   ;;  %s1125_s15 = sphi %s1168_s15, %s1564_s15   ;;  %s1121_s14 = sphi %s1166_s14, %s1563_s14   ;;  %s1117_s13 = sphi %s1164_s13, %s1562_s13   ;;  %s1113_s12 = sphi %s1162_s12, %s1561_s12  }
   0x4   : > { %s1187_s18 = sadd.s32 1, %s1125_s15   ;;  %s50_s19 = sadd.s32 1, %s1121_s14 }
   0x5   : > { %s47_s20 = ssub.s32 %s1125_s15, %s1187_s18  ;;  %p60_p0 = scmp.ne.s32.totalorder %s1121_s14, %s1117_s13 }
   0x6   : > { %p48_p1 = scmp.eq.s32.totalorder %s47_s20, 0  ;;  %p61_p2 = scmp.eq.s32.totalorder %s1183_s16, 3 }
   0x7   : > { %p66_p3 = scmp.ne.s32.totalorder %s1117_s13, %s1113_s12  ;;  %p67_p4 = scmp.eq.s32.totalorder %s991_s17, 3 }
   0x8   : > { %s1198_s21 = scalar_select %p48_p1, %s1121_s14, %s50_s19  }
   0x9   : > { %p1200_p5 = por %p61_p2, %p60_p0  ;;  %p1204_p6 = por %p67_p4, %p66_p3 }
   0xa   : > { %p994_p7 = scmp.ge.s32.totalorder %s1125_s15, 1  ;;  %p145_p8 = scmp.lt.s32.totalorder %s1125_s15, 5 }
   0xc   : > { %p146_p9 = pnand %p994_p7, %p145_p8 }
   0xd   : > { %p175_p10 = scmp.lt.s32.totalorder (!%p146_p9), %s1183_s16, 3  ;;  %s1127_s29 = smov (!%p146_p9), 127  }
   0xe   : > { %149 = sbr.rel (%p146_p9) target bundleno = 588 (0x24c), region = 24  ;;  %s1128_s30 = smov (!%p146_p9), 126  }
   0xf   : > { %s1129_s4 = smov (!%p146_p9), 125   ;;  %s1130_s5 = smov (!%p146_p9), 124  }
  0x10   : > { %s1131_s6 = smov (!%p146_p9), 123   ;;  %s1132_s7 = smov (!%p146_p9), 122  }
  0x11   : > { %s1133_s8 = smov (!%p146_p9), 121   ;;  %s1134_s9 = smov (!%p146_p9), 120  }
  0x12   : > { %s1135_s10 = smov (!%p146_p9), 119   ;;  %s1136_s11 = smov (!%p146_p9), 118  }
  0x13   : > { %s1212_s24 = scalar_select %p175_p10, %s1183_s16, 3  ;;  %vm323_vm0 = vcmask 1046528   ;;  %vm339_vm1 = vcmask 1045504   ;;  %vm355_vm2 = vcmask 1044480   ;;  %vm371_vm3 = vcmask 1043456  }
  0x14   : > { %s1137_s17 = smov 117   ;;  %s1138_s19 = smov 116   ;;  %vm381_vm4 = vcmask 1042432   ;;  %vm401_vm5 = vcmask 1040384   ;;  %vm391_vm6 = vcmask 1041408   ;;  %vm833_vm7 = vcmask 146448  }
  0x15   : > { %s1003_s25 = sshll.u32 %s1212_s24, 5  ;;  %s1139_s20 = smov 2   ;;  %vm830_vm8 = vcmask 130048  }
  0x16   : > { %s1218_s28 = scalar_lea.vmem %s1555_s0, %s1003_s25  ;;  %s162_s25 = sand.u32 1, %s1117_s13  }
  0x17   : > { %v1221_v0 = vld [vmem:[%s1218_s28 + $0x10] sm:$0xff]  ;;  %v1224_v1 = vld [vmem:[%s1218_s28] sm:$0xff]  ;;  %v1245_v6 = vld [vmem:[%s1218_s28 + $0x8] sm:$0xff]  ;;  %s995_s26 = sshll.u32 %s162_s25, 4  ;;  %s1004_s27 = sshll.u32 %s1183_s16, 4 }
  0x18   : > { %v1227_v2 = vld [vmem:[%s1218_s28 + $0x2] sm:$0xff]  ;;  %v1230_v3 = vmul.f32 0.016401323, %v1221_v0  ;;  %v1233_v4 = vmul.f32 0.016401323, %v1224_v1  ;;  %v1248_v7 = vld [vmem:[%s1218_s28 + $0xa] sm:$0xff] }
  0x19   : > { %v1236_v5 = vmul.f32 0.04981729, %v1227_v2  ;;  %v446_v8 = vmul.f32 0.038398698, %v1224_v1  ;;  %v1252_v9 = vmul.f32 0.016401323, %v1245_v6 }
  0x1a   : > { %434 = vrot.lane.b32.xlu2 %v1230_v3, %s1127_s29  ;;  %430 = vrot.lane.b32.xlu1 %v1233_v4, %s1127_s29  ;;  %v1255_v10 = vmul.f32 0.04981729, %v1248_v7  ;;  %v470_v11 = vmul.f32 0.07441439, %v1224_v1  ;;  %v448_v12 = vmul.f32 0.038398698, %v1221_v0 }
  0x1b   : > { %198 = vrot.lane.b32.xlu0 %v1236_v5, %s1127_s29  ;;  %v447_v13 = vmul.f32 0.038398698, %v1245_v6  ;;  %v494_v14 = vmul.f32 0.11937133, %v1224_v1  ;;  %v472_v15 = vmul.f32 0.07441439, %v1221_v0 }
  0x1c   : > { %v471_v16 = vmul.f32 0.07441439, %v1245_v6  ;;  %v518_v17 = vmul.f32 0.15850608, %v1224_v1  ;;  %v496_v18 = vmul.f32 0.11937133, %v1221_v0 }
  0x1d   : > { %v495_v19 = vmul.f32 0.11937133, %v1245_v6  ;;  %v542_v20 = vmul.f32 0.17421861, %v1224_v1  ;;  %v520_v21 = vmul.f32 0.15850608, %v1221_v0 }
  0x1e   : > { %v519_v22 = vmul.f32 0.15850608, %v1245_v6  ;;  %v544_v23 = vmul.f32 0.17421861, %v1221_v0  ;;  %v543_v24 = vmul.f32 0.17421861, %v1245_v6 }
  0x1f   : > { %v417_v25 = vld [vmem:[%s1218_s28 + $0x18] sm:$0xf]  ;;  %v420_v29 = vmul.f32 0.0057988777, %v1221_v0  ;;  %v419_v34 = vmul.f32 0.0057988777, %v1245_v6 }
  0x20   : > { %v425_v26 = vmul.f32 0.016401323, %v417_v25  ;;  %v449_v27 = vmul.f32 0.038398698, %v417_v25  ;;  %v473_v28 = vmul.f32 0.07441439, %v417_v25 }
  0x21   : > { %v497_v32 = vmul.f32 0.11937133, %v417_v25  ;;  %v418_v35 = vmul.f32 0.0057988777, %v1224_v1  ;;  %v545_v37 = vmul.f32 0.17421861, %v417_v25 }
  0x22   : > { %454 = vrot.lane.b32.xlu2 %v446_v8, %s1128_s30  ;;  %432 = vrot.lane.b32.xlu1 %v1252_v9, %s1127_s29  ;;  %v521_v38 = vmul.f32 0.15850608, %v417_v25  ;;  %v1327_v45 = vmul.f32 0.014839454, %v1248_v7  ;;  %v188_v46 = vld [vmem:[%s1218_s28 + $0x12] sm:$0xff]  ;;  %s164_s28 = scalar_lea.vmem [#allocation2], %s995_s26 }
  0x23   : > { %200 = vrot.lane.b32.xlu0 %v1255_v10, %s1127_s29  ;;  %v1337_v52 = vmul.f32 0.0057988777, %v417_v25  ;;  %v194_v53 = vmul.f32 0.04981729, %v188_v46  ;;  %v211_v59 = vmul.f32 0.11832251, %v1248_v7 }
  0x24   : > { %v212_v60 = vmul.f32 0.11832251, %v188_v46  ;;  %v210_v61 = vmul.f32 0.11832251, %v1227_v2  ;;  %v228_v6 = vmul.f32 0.198829, %v1227_v2 }
  0x2a   : > { %478 = vrot.lane.b32.xlu2 %v470_v11, %s1129_s4  ;;  %458 = vrot.lane.b32.xlu1 %v448_v12, %s1128_s30 }
  0x2b   : > { %456 = vrot.lane.b32.xlu0 %v447_v13, %s1128_s30 }
  0x32   : > { %502 = vrot.lane.b32.xlu2 %v494_v14, %s1130_s5  ;;  %482 = vrot.lane.b32.xlu1 %v472_v15, %s1129_s4 }
  0x33   : > { %480 = vrot.lane.b32.xlu0 %v471_v16, %s1129_s4 }
  0x3a   : > { %526 = vrot.lane.b32.xlu2 %v518_v17, %s1131_s6  ;;  %506 = vrot.lane.b32.xlu1 %v496_v18, %s1130_s5 }
  0x3b   : > { %504 = vrot.lane.b32.xlu0 %v495_v19, %s1130_s5 }
  0x42   : > { %550 = vrot.lane.b32.xlu2 %v542_v20, %s1132_s7  ;;  %530 = vrot.lane.b32.xlu1 %v520_v21, %s1131_s6 }
  0x43   : > { %528 = vrot.lane.b32.xlu0 %v519_v22, %s1131_s6 }
  0x4a   : > { %566 = vrot.lane.b32.xlu2 %v518_v17, %s1133_s8  ;;  %554 = vrot.lane.b32.xlu1 %v544_v23, %s1132_s7 }
  0x4b   : > { %552 = vrot.lane.b32.xlu0 %v543_v24, %s1132_s7 }
  0x52   : > { %582 = vrot.lane.b32.xlu2 %v494_v14, %s1134_s9  ;;  %570 = vrot.lane.b32.xlu1 %v520_v21, %s1133_s8  ;;  %v248_v14 = vmul.f32 0.23638351, %v188_v46 }
  0x53   : > { %568 = vrot.lane.b32.xlu0 %v519_v22, %s1133_s8 }
  0x5a   : > { %586 = vrot.lane.b32.xlu1 %v496_v18, %s1134_s9  ;;  %436 = vrot.lane.b32.xlu2 %v425_v26, %s1127_s29 }
  0x5b   : > { %584 = vrot.lane.b32.xlu0 %v495_v19, %s1134_s9 }
  0x62   : > { %600 = vrot.lane.b32.xlu1 %v471_v16, %s1135_s10  ;;  %602 = vrot.lane.b32.xlu2 %v472_v15, %s1135_s10  ;;  %v246_v15 = vmul.f32 0.23638351, %v1227_v2 }
  0x63   : > { %598 = vrot.lane.b32.xlu0 %v470_v11, %s1135_s10 }
  0x6a   : > { %614 = vrot.lane.b32.xlu1 %v446_v8, %s1136_s11  ;;  %616 = vrot.lane.b32.xlu2 %v447_v13, %s1136_s11  ;;  %v247_v13 = vmul.f32 0.23638351, %v1248_v7 }
  0x6b   : > { %460 = vrot.lane.b32.xlu0 %v449_v27, %s1128_s30 }
  0x72   : > { %484 = vrot.lane.b32.xlu1 %v473_v28, %s1129_s4  ;;  %630 = vrot.lane.b32.xlu2 %v1233_v4, %s1137_s17  ;;  %v230_v4 = vmul.f32 0.198829, %v188_v46 }
  0x73   : > { %618 = vrot.lane.b32.xlu0 %v448_v12, %s1136_s11 }
  0x74   : > { %v435_v30 = vpop.permute.xlu2 %434 }
  0x75   : > { %v444_v31 = vadd.f32 %v435_v30, %v420_v29 }
  0x7a   : > { %634 = vrot.lane.b32.xlu1 %v1230_v3, %s1137_s17  ;;  %508 = vrot.lane.b32.xlu2 %v497_v32, %s1130_s5  ;;  %v229_v3 = vmul.f32 0.198829, %v1248_v7 }
  0x7b   : > { %632 = vrot.lane.b32.xlu0 %v1252_v9, %s1137_s17 }
  0x7c   : > { %v455_v33 = vpop.permute.xlu2 %454 }
  0x82   : > { %652 = vrot.lane.b32.xlu1 %v419_v34, %s1138_s19  ;;  %654 = vrot.lane.b32.xlu2 %v420_v29, %s1138_s19 }
  0x83   : > { %650 = vrot.lane.b32.xlu0 %v418_v35, %s1138_s19 }
  0x84   : > { %v479_v36 = vpop.permute.xlu2 %478 }
  0x8a   : > { %556 = vrot.lane.b32.xlu1 %v545_v37, %s1132_s7  ;;  %572 = vrot.lane.b32.xlu2 %v521_v38, %s1133_s8 }
  0x8b   : > { %532 = vrot.lane.b32.xlu0 %v521_v38, %s1131_s6 }
  0x8c   : > { %v1319_v39 = vpop.permute.xlu2 %502  ;;  %v431_v40 = vpop.permute.xlu1 %430 }
  0x8d   : > { %v442_v41 = vadd.f32 %v431_v40, %v418_v35  ;;  %v1321_v42 = vpop.permute.xlu0 %198 }
  0x8f   : > { %v466_v43 = vadd.f32 %v455_v33, %v442_v41 }
  0x91   : > { %v1323_v44 = vadd.f32 %v479_v36, %v466_v43 }
  0x92   : > { %604 = vrot.lane.b32.xlu1 %v473_v28, %s1135_s10  ;;  %620 = vrot.lane.b32.xlu2 %v449_v27, %s1136_s11  ;;  %v1372_v27 = vmul.f32 0.014839454, %v188_v46  ;;  %v1375_v28 = vmul.f32 0.014839454, %v1227_v2  ;;  %s1083_s11 = scalar_lea.hbm %s1556_s1, 64 }
  0x93   : > { %588 = vrot.lane.b32.xlu0 %v497_v32, %s1134_s9  ;;  %v514_v35 = vadd.f32 %v1319_v39, %v1323_v44 }
  0x94   : > { %v1332_v47 = vpop.permute.xlu2 %526  ;;  %v433_v48 = vpop.permute.xlu1 %432 }
  0x95   : > { %v443_v49 = vadd.f32 %v433_v48, %v419_v34  ;;  %v201_v50 = vpop.permute.xlu0 %200  ;;  %v538_v46 = vadd.f32 %v1332_v47, %v514_v35 }
  0x96   : > { %v1335_v51 = vadd.f32 %v201_v50, %v1327_v45 }
  0x9a   : > { %656 = vrot.lane.b32.xlu1 %v1337_v52, %s1138_s19  ;;  %202 = vrot.lane.b32.xlu2 %v194_v53, %s1127_s29 }
  0x9b   : > { %636 = vrot.lane.b32.xlu0 %v425_v26, %s1137_s17 }
  0x9c   : > { %v1342_v54 = vpop.permute.xlu2 %550  ;;  %v459_v55 = vpop.permute.xlu1 %458 }
  0x9d   : > { %v468_v56 = vadd.f32 %v459_v55, %v444_v31  ;;  %v457_v57 = vpop.permute.xlu0 %456 }
  0x9e   : > { %v467_v58 = vadd.f32 %v457_v57, %v443_v49  ;;  %v562_v49 = vadd.f32 %v1342_v54, %v538_v46 }
  0xa2   : > { %218 = vrot.lane.b32.xlu1 %v211_v59, %s1128_s30  ;;  %220 = vrot.lane.b32.xlu2 %v212_v60, %s1128_s30 }
  0xa3   : > { %216 = vrot.lane.b32.xlu0 %v210_v61, %s1128_s30 }
  0xa4   : > { %v1349_v62 = vpop.permute.xlu2 %566  ;;  %v483_v63 = vpop.permute.xlu1 %482 }
  0xa5   : > { %v492_v0 = vadd.f32 %v483_v63, %v468_v56  ;;  %v481_v1 = vpop.permute.xlu0 %480  ;;  %v578_v55 = vadd.f32 %v1349_v62, %v562_v49 }
  0xa6   : > { %v491_v34 = vadd.f32 %v481_v1, %v467_v58 }
  0xaa   : > { %236 = vrot.lane.b32.xlu1 %v229_v3, %s1129_s4  ;;  %238 = vrot.lane.b32.xlu2 %v230_v4, %s1129_s4 }
  0xab   : > { %234 = vrot.lane.b32.xlu0 %v228_v6, %s1129_s4 }
  0xac   : > { %v583_v8 = vpop.permute.xlu2 %582  ;;  %v507_v9 = vpop.permute.xlu1 %506 }
  0xad   : > { %v516_v11 = vadd.f32 %v507_v9, %v492_v0  ;;  %v505_v12 = vpop.permute.xlu0 %504  ;;  %v594_v39 = vadd.f32 %v583_v8, %v578_v55 }
  0xae   : > { %v515_v36 = vadd.f32 %v505_v12, %v491_v34 }
  0xb2   : > { %254 = vrot.lane.b32.xlu1 %v247_v13, %s1130_s5  ;;  %256 = vrot.lane.b32.xlu2 %v248_v14, %s1130_s5 }
  0xb3   : > { %252 = vrot.lane.b32.xlu0 %v246_v15, %s1130_s5  ;;  %s882_s5 = sshll.u32 %s164_s28, 4  ;;  %s883_s5 = int_to_ptr.vmem [resolvable:$true] %s882_s5 }
  0xb4   : > { %v531_v16 = vpop.permute.xlu1 %530  ;;  %v437_v17 = vpop.permute.xlu2 %436 }
  0xb5   : > { %v529_v18 = vpop.permute.xlu0 %528  ;;  %v540_v33 = vadd.f32 %v531_v16, %v516_v11  ;;  %v445_v47 = vadd.f32 %v437_v17, %v1337_v52 }
  0xb6   : > { %v539_v41 = vadd.f32 %v529_v18, %v515_v36 }
  0xba   : > { %266 = vrot.lane.b32.xlu1 %v229_v3, %s1131_s6  ;;  %268 = vrot.lane.b32.xlu2 %v230_v4, %s1131_s6 }
  0xbb   : > { %264 = vrot.lane.b32.xlu0 %v228_v6, %s1131_s6 }
  0xbc   : > { %v555_v19 = vpop.permute.xlu1 %554  ;;  %v603_v7 = vpop.permute.xlu2 %602 }
  0xbd   : > { %v553_v20 = vpop.permute.xlu0 %552  ;;  %v564_v2 = vadd.f32 %v555_v19, %v540_v33 }
  0xbe   : > { %v563_v48 = vadd.f32 %v553_v20, %v539_v41 }
  0xc2   : > { %278 = vrot.lane.b32.xlu1 %v211_v59, %s1132_s7  ;;  %280 = vrot.lane.b32.xlu2 %v212_v60, %s1132_s7 }
  0xc3   : > { %276 = vrot.lane.b32.xlu0 %v210_v61, %s1132_s7  ;;  %s864_s7 = scalar_lea.sflag [#allocation3], %s162_s25 }
  0xc4   : > { %v571_v21 = vpop.permute.xlu1 %570  ;;  %v617_v22 = vpop.permute.xlu2 %616 }
  0xc5   : > { %v569_v23 = vpop.permute.xlu0 %568  ;;  %v580_v37 = vadd.f32 %v571_v21, %v564_v2 }
  0xc6   : > { %v579_v50 = vadd.f32 %v569_v23, %v563_v48 }
  0xca   : > { %290 = vrot.lane.b32.xlu1 %v1255_v10, %s1133_s8  ;;  %292 = vrot.lane.b32.xlu2 %v194_v53, %s1133_s8 }
  0xcb   : > { %288 = vrot.lane.b32.xlu0 %v1236_v5, %s1133_s8 }
  0xcc   : > { %v587_v24 = vpop.permute.xlu1 %586  ;;  %v631_v25 = vpop.permute.xlu2 %630 }
  0xcd   : > { %v585_v26 = vpop.permute.xlu0 %584  ;;  %v596_v43 = vadd.f32 %v587_v24, %v580_v37 }
  0xce   : > { %v595_v56 = vadd.f32 %v585_v26, %v579_v50 }
  0xcf   : > { %v612_v53 = vadd.f32 %v603_v7, %v596_v43 }
  0xd2   : > { %305 = vrot.lane.b32.xlu1 %v1327_v45, %s1134_s9  ;;  %307 = vrot.lane.b32.xlu2 %v1372_v27, %s1134_s9 }
  0xd3   : > { %303 = vrot.lane.b32.xlu0 %v1375_v28, %s1134_s9 }
  0xd4   : > { %v601_v10 = vpop.permute.xlu1 %600  ;;  %v1383_v29 = vpop.permute.xlu2 %508 }
  0xd5   : > { %v599_v5 = vpop.permute.xlu0 %598  ;;  %v611_v59 = vadd.f32 %v601_v10, %v595_v56 }
  0xd6   : > { %v610_v63 = vadd.f32 %v599_v5, %v594_v39 }
  0xd7   : > { %v627_v54 = vadd.f32 %v617_v22, %v611_v59 }
  0xdc   : > { %v615_v30 = vpop.permute.xlu1 %614  ;;  %v655_v31 = vpop.permute.xlu2 %654 }
  0xdd   : > { %v461_v32 = vpop.permute.xlu0 %460  ;;  %v626_v1 = vadd.f32 %v615_v30, %v610_v63 }
  0xde   : > { %v469_v6 = vadd.f32 %v461_v32, %v445_v47 }
  0xdf   : > { %v642_v12 = vadd.f32 %v631_v25, %v626_v1 }
  0xe4   : > { %v485_v38 = vpop.permute.xlu1 %484  ;;  %v1387_v40 = vpop.permute.xlu2 %572 }
  0xe5   : > { %v619_v45 = vpop.permute.xlu0 %618  ;;  %v493_v13 = vadd.f32 %v485_v38, %v469_v6 }
  0xe6   : > { %v628_v57 = vadd.f32 %v619_v45, %v612_v53 }
  0xe7   : > { %v517_v30 = vadd.f32 %v1383_v29, %v493_v13 }
  0xec   : > { %v635_v44 = vpop.permute.xlu1 %634  ;;  %v1392_v58 = vpop.permute.xlu2 %620 }
  0xed   : > { %v644_v60 = vadd.f32 %v635_v44, %v628_v57  ;;  %v633_v61 = vpop.permute.xlu0 %632 }
  0xee   : > { %v643_v11 = vadd.f32 %v633_v61, %v627_v54 }
  0xef   : > { %v1394_v0 = vadd.f32 %v655_v31, %v644_v60 }
  0xf1   : > { %v1398_v3 = vmul.f32 0.016401323, %v1394_v0  ;;  %v1401_v62 = vmul.f32 0.038398698, %v1394_v0  ;;  %v1404_v4 = vmul.f32 0.07441439, %v1394_v0 }
  0xf2   : > { %v1407_v8 = vmul.f32 0.11937133, %v1394_v0  ;;  %v1410_v9 = vmul.f32 0.15850608, %v1394_v0  ;;  %v1413_v52 = vmul.f32 0.0057988777, %v1394_v0 }
  0xf3   : > { %v677_v16 = vrot.slane %v1398_v3, 1  ;;  %v692_v17 = vrot.slane %v1401_v62, 2  ;;  %v707_v7 = vrot.slane %v1404_v4, 3  ;;  %v772_v21 = vrot.slane %v1404_v4, 1 }
  0xf4   : > { %v653_v14 = vpop.permute.xlu1 %652  ;;  %v1415_v15 = vpop.permute.xlu2 %202  ;;  %v722_v20 = vrot.slane %v1407_v8, 4  ;;  %v737_v23 = vrot.slane %v1410_v9, 5  ;;  %v790_v24 = vrot.slane %v1398_v3, 3  ;;  %v804_v25 = vrot.slane %v1413_v52, 4 }
  0xf5   : > { %v663_v18 = vadd.f32 %v653_v14, %v643_v11  ;;  %v651_v19 = vpop.permute.xlu0 %650  ;;  %v745_v61 = vmul.f32 0.17421861, %v1394_v0  ;;  %v209_v62 = vadd.f32 %v1415_v15, %v1372_v27 }
  0xf6   : > { %v662_v22 = vadd.f32 %v651_v19, %v642_v12 }
  0xf7   : > { %v1425_v26 = vmul.f32 0.0057988777, %v663_v18  ;;  %v1427_v10 = vmul.f32 0.016401323, %v663_v18  ;;  %v684_v5 = vmul.f32 0.038398698, %v663_v18 }
  0xf8   : > { %v698_v31 = vmul.f32 0.07441439, %v662_v22  ;;  %v713_v32 = vmul.f32 0.11937133, %v662_v22  ;;  %v666_v33 = vmul.f32 0.0057988777, %v662_v22 }
  0xf9   : > { %v668_v34 = vmul.f32 0.016401323, %v662_v22  ;;  %v675_v2 = vrot.slane %v1427_v10, 1  ;;  %v683_v35 = vmul.f32 0.038398698, %v662_v22  ;;  %v690_v36 = vrot.slane %v684_v5, 2 }
  0xfa   : > { %v704_v37 = vrot.slane %v698_v31, 3  ;;  %v699_v38 = vmul.f32 0.07441439, %v663_v18  ;;  %v1431_v41 = vmul.f32 0.11937133, %v663_v18  ;;  %v719_v43 = vrot.slane %v713_v32, 4 }
  0xfb   : > { %v674_v45 = vrot.slane %v668_v34, 1  ;;  %v678_v46 = vsel %vm323_vm0, %v675_v2, %v677_v16  ;;  %v689_v48 = vrot.slane %v683_v35, 2  ;;  %v1437_v29 = vsel %vm339_vm1, %v690_v36, %v692_v17 }
  0xfc   : > { %v557_v49 = vpop.permute.xlu1 %556  ;;  %v682_v50 = vadd.f32 %v678_v46, %v1425_v26  ;;  %v705_v53 = vrot.slane %v699_v38, 3  ;;  %v720_v55 = vrot.slane %v1431_v41, 4  ;;  %v728_v56 = vmul.f32 0.15850608, %v662_v22  ;;  %v1441_v39 = vpop.permute.xlu2 %220 }
  0xfd   : > { %v533_v57 = vpop.permute.xlu0 %532  ;;  %v676_v44 = vsel %vm323_vm0, %v674_v45, %v675_v2  ;;  %v691_v59 = vsel %vm339_vm1, %v689_v48, %v690_v36  ;;  %v729_v60 = vmul.f32 0.15850608, %v663_v18  ;;  %v743_v31 = vmul.f32 0.17421861, %v662_v22 }
  0xfe   : > { %v541_v63 = vadd.f32 %v533_v57, %v517_v30  ;;  %v681_v47 = vadd.f32 %v676_v44, %v666_v33  ;;  %v697_v1 = vadd.f32 %v1437_v29, %v682_v50  ;;  %v706_v54 = vsel %vm355_vm2, %v704_v37, %v705_v53 }
  0xff   : > { %v708_v6 = vsel %vm355_vm2, %v705_v53, %v707_v7  ;;  %v721_v11 = vsel %vm371_vm3, %v719_v43, %v720_v55  ;;  %v723_v12 = vsel %vm371_vm3, %v720_v55, %v722_v20  ;;  %v734_v13 = vrot.slane %v728_v56, 5 }
 0x100   : > { %v565_v14 = vadd.f32 %v557_v49, %v541_v63  ;;  %v696_v16 = vadd.f32 %v691_v59, %v681_v47  ;;  %v712_v19 = vadd.f32 %v708_v6, %v697_v1  ;;  %v735_v5 = vrot.slane %v729_v60, 5 }
 0x101   : > { %v744_v32 = vmul.f32 0.17421861, %v663_v18  ;;  %v758_v0 = vrot.slane %v728_v56, 7  ;;  %v759_v30 = vrot.slane %v729_v60, 7  ;;  %v749_v36 = vrot.slane %v743_v31, 6 }
 0x102   : > { %v581_v33 = vadd.f32 %v1387_v40, %v565_v14  ;;  %v711_v34 = vadd.f32 %v706_v54, %v696_v16  ;;  %v727_v2 = vadd.f32 %v723_v12, %v712_v19  ;;  %v736_v35 = vsel %vm381_vm4, %v734_v13, %v735_v5 }
 0x103   : > { %v738_v7 = vsel %vm381_vm4, %v735_v5, %v737_v23  ;;  %v750_v37 = vrot.slane %v744_v32, 6  ;;  %v760_v20 = vsel %vm401_vm5, %v758_v0, %v759_v30  ;;  %v771_v48 = vrot.slane %v699_v38, 1 }
 0x104   : > { %v605_v43 = vpop.permute.xlu1 %604  ;;  %v726_v45 = vadd.f32 %v721_v11, %v711_v34  ;;  %v742_v46 = vadd.f32 %v738_v7, %v727_v2  ;;  %v789_v18 = vrot.slane %v1427_v10, 3  ;;  %v803_v40 = vrot.slane %v1425_v26, 4  ;;  %v239_v57 = vpop.permute.xlu2 %238 }
 0x105   : > { %v589_v22 = vpop.permute.xlu0 %588  ;;  %v751_v49 = vsel %vm391_vm6, %v749_v36, %v750_v37  ;;  %v752_v50 = vrot.slane %v745_v61, 6  ;;  %v761_v53 = vrot.slane %v1410_v9, 7  ;;  %v773_v56 = vsel %vm323_vm0, %v771_v48, %v772_v21 }
 0x106   : > { %v597_v55 = vadd.f32 %v589_v22, %v581_v33  ;;  %v741_v23 = vadd.f32 %v736_v35, %v726_v45  ;;  %v791_v38 = vsel %vm355_vm2, %v789_v18, %v790_v24  ;;  %v805_v10 = vsel %vm371_vm3, %v803_v40, %v804_v25 }
 0x107   : > { %v753_v26 = vsel %vm391_vm6, %v750_v37, %v752_v50  ;;  %v762_v44 = vsel %vm401_vm5, %v759_v30, %v761_v53 }
 0x108   : > { %v613_v9 = vadd.f32 %v605_v43, %v597_v55  ;;  %v756_v59 = vadd.f32 %v751_v49, %v741_v23  ;;  %v757_v60 = vadd.f32 %v753_v26, %v742_v46 }
 0x10a   : > { %v765_v61 = vadd.f32 %v760_v20, %v756_v59  ;;  %v766_v63 = vadd.f32 %v762_v44, %v757_v60  ;;  %v629_v1 = vadd.f32 %v1392_v58, %v613_v9 }
 0x10c   : > { %v657_v47 = vpop.permute.xlu1 %656  ;;  %v767_v54 = vadd.f32 %v765_v61, %v1431_v41  ;;  %v768_v6 = vadd.f32 %v766_v63, %v1407_v8  ;;  %v257_v19 = vpop.permute.xlu2 %256 }
 0x10d   : > { %v637_v11 = vpop.permute.xlu0 %636 }
 0x10e   : > { %v645_v12 = vadd.f32 %v637_v11, %v629_v1  ;;  %v778_v13 = vadd.f32 %v773_v56, %v767_v54  ;;  %v207_v56 = vadd.f32 %v1321_v42, %v1375_v28 }
 0x110   : > { %v665_v14 = vadd.f32 %v657_v47, %v645_v12  ;;  %v785_v16 = vadd.f32 %v778_v13, %v1437_v29 }
 0x112   : > { %v769_v5 = vmul.f32 0.07441439, %v665_v14  ;;  %v780_v31 = vmul.f32 0.038398698, %v665_v14  ;;  %v787_v32 = vmul.f32 0.016401323, %v665_v14  ;;  %v796_v0 = vadd.f32 %v791_v38, %v785_v16 }
 0x113   : > { %v799_v30 = vmul.f32 0.0057988777, %v665_v14 }
 0x114   : > { %v774_v33 = vrot.slane %v769_v5, 1  ;;  %v782_v34 = vrot.slane %v780_v31, 2  ;;  %v792_v2 = vrot.slane %v787_v32, 3  ;;  %v219_v58 = vpop.permute.xlu1 %218  ;;  %v810_v35 = vadd.f32 %v805_v10, %v796_v0  ;;  %v269_v46 = vpop.permute.xlu2 %268 }
 0x115   : > { %v217_v41 = vpop.permute.xlu0 %216  ;;  %v806_v7 = vrot.slane %v799_v30, 4  ;;  %v226_v27 = vadd.f32 %v219_v58, %v1335_v51 }
 0x116   : > { %814 = vrot.lane.b32.xlu0 %v810_v35, %s1139_s20  ;;  %v775_v8 = vsel %vm323_vm0, %v772_v21, %v774_v33  ;;  %v783_v29 = vsel %vm339_vm1, %v692_v17, %v782_v34  ;;  %v793_v36 = vsel %vm355_vm2, %v790_v24, %v792_v2  ;;  %v227_v17 = vadd.f32 %v1441_v39, %v209_v62 }
 0x117   : > { %v779_v37 = vadd.f32 %v775_v8, %v768_v6  ;;  %v807_v20 = vsel %vm371_vm3, %v804_v25, %v806_v7  ;;  %v225_v39 = vadd.f32 %v217_v41, %v207_v56 }
 0x118   : > { %v245_v22 = vadd.f32 %v239_v57, %v227_v17 }
 0x119   : > { %v786_v43 = vadd.f32 %v783_v29, %v779_v37 }
 0x11a   : > { %v263_v49 = vadd.f32 %v257_v19, %v245_v22 }
 0x11b   : > { %v797_v45 = vadd.f32 %v793_v36, %v786_v43 }
 0x11c   : > { %v237_v48 = vpop.permute.xlu1 %236  ;;  %v281_v24 = vpop.permute.xlu2 %280  ;;  %v275_v50 = vadd.f32 %v269_v46, %v263_v49 }
 0x11d   : > { %v235_v4 = vpop.permute.xlu0 %234  ;;  %v811_v18 = vadd.f32 %v807_v20, %v797_v45  ;;  %v244_v10 = vadd.f32 %v237_v48, %v226_v27 }
 0x11e   : > { %v287_v53 = vadd.f32 %v281_v24, %v275_v50  ;;  %v243_v26 = vadd.f32 %v235_v4, %v225_v39 }
 0x11f   : > { %816 = vrot.lane.b32.xlu1 %v811_v18, %s1139_s20 }
 0x124   : > { %v255_v3 = vpop.permute.xlu1 %254  ;;  %v293_v25 = vpop.permute.xlu2 %292 }
 0x125   : > { %v253_v21 = vpop.permute.xlu0 %252  ;;  %v299_v38 = vadd.f32 %v293_v25, %v287_v53  ;;  %v262_v9 = vadd.f32 %v255_v3, %v244_v10 }
 0x126   : > { %v261_v60 = vadd.f32 %v253_v21, %v243_v26 }
 0x12c   : > { %v267_v52 = vpop.permute.xlu1 %266  ;;  %v308_v15 = vpop.permute.xlu2 %307 }
 0x12d   : > { %v265_v40 = vpop.permute.xlu0 %264  ;;  %v1492_v57 = vadd.f32 %v308_v15, %v299_v38  ;;  %v274_v61 = vadd.f32 %v267_v52, %v262_v9 }
 0x12e   : > { %v273_v63 = vadd.f32 %v265_v40, %v261_v60 }
 0x12f   : > { %v351_v47 = vmul.f32 0.198829, %v1492_v57  ;;  %v319_v42 = vmul.f32 0.04981729, %v1492_v57  ;;  %v335_v28 = vmul.f32 0.11832251, %v1492_v57 }
 0x130   : > { %v367_v51 = vmul.f32 0.23638351, %v1492_v57 }
 0x131   : > { %v359_v12 = vrot.slane %v351_v47, 3  ;;  %v327_v5 = vrot.slane %v319_v42, 1  ;;  %v343_v31 = vrot.slane %v335_v28, 2  ;;  %v385_v0 = vrot.slane %v351_v47, 5 }
 0x132   : > { %v375_v14 = vrot.slane %v367_v51, 4  ;;  %v395_v30 = vrot.slane %v335_v28, 6  ;;  %v405_v33 = vrot.slane %v319_v42, 7 }
 0x134   : > { %v279_v55 = vpop.permute.xlu1 %278 }
 0x135   : > { %v277_v23 = vpop.permute.xlu0 %276  ;;  %v286_v1 = vadd.f32 %v279_v55, %v274_v61 }
 0x136   : > { %v285_v54 = vadd.f32 %v277_v23, %v273_v63 }
 0x13c   : > { %v291_v44 = vpop.permute.xlu1 %290 }
 0x13d   : > { %v289_v59 = vpop.permute.xlu0 %288  ;;  %v298_v6 = vadd.f32 %v291_v44, %v286_v1 }
 0x13e   : > { %v297_v11 = vadd.f32 %v289_v59, %v285_v54 }
 0x144   : > { %v306_v13 = vpop.permute.xlu1 %305 }
 0x145   : > { %v313_v16 = vadd.f32 %v306_v13, %v298_v6  ;;  %v304_v19 = vpop.permute.xlu0 %303 }
 0x146   : > { %v312_v32 = vadd.f32 %v304_v19, %v297_v11  ;;  %v411_v11 = vmul.f32 0.014839454, %v1492_v57 }
 0x147   : > { %v334_v34 = vmul.f32 0.11832251, %v313_v16  ;;  %v350_v2 = vmul.f32 0.198829, %v313_v16  ;;  %v366_v58 = vmul.f32 0.23638351, %v313_v16 }
 0x148   : > { %v315_v35 = vmul.f32 0.014839454, %v312_v32  ;;  %v333_v41 = vmul.f32 0.11832251, %v312_v32  ;;  %v349_v7 = vmul.f32 0.198829, %v312_v32 }
 0x149   : > { %v357_v8 = vrot.slane %v350_v2, 3  ;;  %v373_v29 = vrot.slane %v366_v58, 4  ;;  %v365_v36 = vmul.f32 0.23638351, %v312_v32  ;;  %v316_v37 = vmul.f32 0.014839454, %v313_v16 }
 0x14a   : > { %v340_v20 = vrot.slane %v333_v41, 2  ;;  %v356_v43 = vrot.slane %v349_v7, 3  ;;  %v318_v45 = vmul.f32 0.04981729, %v313_v16  ;;  %v341_v46 = vrot.slane %v334_v34, 2 }
 0x14b   : > { %v372_v48 = vrot.slane %v365_v36, 4  ;;  %v360_v4 = vsel %vm355_vm2, %v357_v8, %v359_v12  ;;  %v383_v18 = vrot.slane %v350_v2, 5  ;;  %v393_v62 = vrot.slane %v334_v34, 6 }
 0x14c   : > { %v325_v17 = vrot.slane %v318_v45, 1  ;;  %v344_v3 = vsel %vm339_vm1, %v341_v46, %v343_v31  ;;  %v403_v21 = vrot.slane %v318_v45, 7  ;;  %v317_v24 = vmul.f32 0.04981729, %v312_v32 }
 0x14d   : > { %v342_v22 = vsel %vm339_vm1, %v340_v20, %v341_v46  ;;  %v358_v49 = vsel %vm355_vm2, %v356_v43, %v357_v8  ;;  %v374_v52 = vsel %vm371_vm3, %v372_v48, %v373_v29  ;;  %v382_v40 = vrot.slane %v349_v7, 5 }
 0x14e   : > { %v328_v25 = vsel %vm323_vm0, %v325_v17, %v327_v5  ;;  %v324_v50 = vrot.slane %v317_v24, 1  ;;  %v392_v53 = vrot.slane %v333_v41, 6  ;;  %v402_v55 = vrot.slane %v317_v24, 7 }
 0x14f   : > { %v332_v23 = vadd.f32 %v328_v25, %v316_v37  ;;  %v384_v56 = vsel %vm381_vm4, %v382_v40, %v383_v18  ;;  %v376_v38 = vsel %vm371_vm3, %v373_v29, %v375_v14  ;;  %v386_v27 = vsel %vm381_vm4, %v383_v18, %v385_v0 }
 0x150   : > { %v326_v15 = vsel %vm323_vm0, %v324_v50, %v325_v17  ;;  %v394_v39 = vsel %vm391_vm6, %v392_v53, %v393_v62  ;;  %v404_v10 = vsel %vm401_vm5, %v402_v55, %v403_v21  ;;  %v396_v26 = vsel %vm391_vm6, %v393_v62, %v395_v30 }
 0x151   : > { %v348_v44 = vadd.f32 %v344_v3, %v332_v23  ;;  %v331_v9 = vadd.f32 %v326_v15, %v315_v35  ;;  %v406_v59 = vsel %vm401_vm5, %v403_v21, %v405_v33 }
 0x153   : > { %v364_v60 = vadd.f32 %v360_v4, %v348_v44  ;;  %v347_v61 = vadd.f32 %v342_v22, %v331_v9 }
 0x155   : > { %v363_v63 = vadd.f32 %v358_v49, %v347_v61  ;;  %v380_v47 = vadd.f32 %v376_v38, %v364_v60 }
 0x157   : > { %v379_v1 = vadd.f32 %v374_v52, %v363_v63  ;;  %v390_v42 = vadd.f32 %v386_v27, %v380_v47 }
 0x159   : > { %v389_v28 = vadd.f32 %v384_v56, %v379_v1  ;;  %v400_v51 = vadd.f32 %v396_v26, %v390_v42 }
 0x15b   : > { %v399_v54 = vadd.f32 %v394_v39, %v389_v28  ;;  %v410_v6 = vadd.f32 %v406_v59, %v400_v51 }
 0x15d   : > { %v409_v12 = vadd.f32 %v404_v10, %v399_v54  ;;  %v413_v13 = vadd.f32 %v411_v11, %v410_v6 }
 0x15f   : > { %v412_v14 = vadd.f32 %v409_v12, %v316_v37 }
 0x188   : > { %v815_v16 = vpop.permute.xlu0 %814 }
 0x189   : > { %v820_v19 = vsub.f32 %v412_v14, %v815_v16 }
 0x18b   : > { %824 = vrot.lane.b32.xlu1 %v820_v19, %s1128_s30  ;;  %v849_v32 = vsel %vm833_vm7, %v820_v19, -inf  ;;  %v834_v30 = vsel %vm833_vm7, %v820_v19, inf }
 0x191   : > { %v817_v5 = vpop.permute.xlu1 %816 }
 0x192   : > { %v821_v31 = vsub.f32 %v413_v13, %v817_v5 }
 0x194   : > { %826 = vrot.lane.b32.xlu1 %v821_v31, %s1128_s30  ;;  %v850_v0 = vsel %vm833_vm7, %v821_v31, -inf  ;;  %v835_v33 = vsel %vm833_vm7, %v821_v31, inf  ;;  %s881_s30 = scalar_lea.hbm %s1556_s1, %s1004_s27 }
 0x195   : > { %v851_v34 = vmax.f32 %v849_v32, %v850_v0  ;;  %v836_v57 = vmin.f32 %v834_v30, %v835_v33  ;;  %s884_s6 = sshll.u32 %s881_s30, 4  ;;  %s885_s6 = int_to_ptr.hbm [resolvable:$true] %s884_s6 }
 0x196   : > { %s1077_s8 = sshra.s32 %s885_s6, 4  ;;  %s1078_s8 = int_to_ptr.hbm [resolvable:$true] %s1077_s8 }
 0x197   : > { %852 = vmax.xlane.f32.xlu0 %v851_v34  ;;  %837 = vmin.xlane.f32.xlu2 %v836_v57  ;;  %s1079_s9 = scalar_lea.hbm %s1078_s8, 16  ;;  %p1084_p0 = scmp.lt.s32.totalorder %s1078_s8, %s1556_s1 }
 0x198   : > { %p1080_p11 = scmp.ne.s32.totalorder %s1078_s8, %s1079_s9  ;;  %p1085_p1 = scmp.lt.s32.totalorder %s1083_s11, %s1079_s9 }
 0x19a   : > { %p1081_p12 = pnand %p1080_p11, %p1200_p5  ;;  %p1086_p2 = por %p1085_p1, %p1084_p0 }
 0x19c   : > { %p1082_p13 = pneg %p1081_p12 }
 0x19e   : > { %p1087_p3 = pnand %p1086_p2, %p1082_p13 }
 0x1fd   : > { %v825_v2 = vpop.permute.xlu1 %824 }
 0x1fe   : > { %831 = vst.msk [vmem:[%s164_s28] sm:$0xff] %vm830_vm8, %v825_v2 }
 0x206   : > { %v827_v58 = vpop.permute.xlu1 %826 }
 0x207   : > { %832 = vst.msk [vmem:[%s164_s28 + $0x8] sm:$0xff] %vm830_vm8, %v827_v58 }
 0x208   : > { %1090 = shalt.err (!%p1087_p3)
}
 0x209   : > { %s1140_s20 = smov 128   ;;  %s1141_s25 = smov 8   ;;  %vm847_vm9 = vcmask 0  }
 0x20a   : > { %1009 = dma.vmem_to_hbm [thread:$0]  (%p1200_p5), %s883_s5, 256, %s885_s6, %s864_s7, %s1140_s20, %s1140_s20, %s1141_s25   ;;  %v853_v35 = vpop.xlane.xlu0 %852  ;;  %v838_v41 = vpop.xlane.xlu2 %837 }
 0x20b   : > { %v854_v7 = vrot.slane %v853_v35, 4  ;;  %v839_v8 = vrot.slane %v838_v41, 4  ;;  %s182_s27 = scalar_lea.vmem %s1557_s2, %s1212_s24  ;;  %s185_s30 = scalar_lea.vmem %s1558_s3, %s1212_s24 }
 0x20d   : > { %v855_v29 = vmax.f32 %v853_v35, %v854_v7  ;;  %v840_v36 = vmin.f32 %v838_v41, %v839_v8 }
 0x20f   : > { %v856_v37 = vrot.slane %v855_v29, 2  ;;  %v841_v20 = vrot.slane %v840_v36, 2 }
 0x211   : > { %v857_v43 = vmax.f32 %v855_v29, %v856_v37  ;;  %v842_v45 = vmin.f32 %v840_v36, %v841_v20 }
 0x213   : > { %v843_v46 = vrot.slane %v842_v45, 1  ;;  %v858_v48 = vrot.slane %v857_v43, 1 }
 0x215   : > { %v844_v4 = vmin.f32 %v842_v45, %v843_v46  ;;  %v859_v18 = vmax.f32 %v857_v43, %v858_v48 }
 0x217   : > { %1005 = vpush %v844_v4 }
 0x218   : > { %1007 = vpush %v859_v18 }
 0x248   : > { %s1006_s28 = spop %1005 }
 0x249   : > { %v846_v62 = vstv %s1006_s28  ;;  %s1008_s5 = spop %1007 }
 0x24a   : > { %848 = vst.msk [vmem:[%s182_s27] sm:$0x1] %vm847_vm9, %v846_v62  ;;  %v861_v17 = vstv %s1008_s5 }
 0x24b   : > { %862 = vst.msk [vmem:[%s185_s30] sm:$0x1] %vm847_vm9, %v861_v17 }
 0x24c PF: > { %p1015_p4 = scmp.ge.s32.totalorder %s1125_s15, 2  ;;  %s905_s6 = sand.u32 1, %s1113_s12  }
 0x24d   : > { %s906_s7 = scalar_lea.sflag [#allocation3], %s905_s6 }
 0x24e   : > { %p1012_p5 = pnand %p1015_p4, %p1204_p6 }
 0x250   : > { %p1013_p7 = pneg %p1012_p5 }
 0x252   : > { %1108 = dma.done.wait (%p1013_p7), %s906_s7, 256  }
 0x253   : > { %1110 = vsyncadd (%p1013_p7), %s906_s7, 4294967040  ;;  %p14_p8 = scmp.ge.s32.totalorder %s1187_s18, 6   ;;  %s1561_s12 = smov %s1117_s13 }
 0x254   : > { %s1562_s13 = smov %s1121_s14  ;;  %s1563_s14 = smov %s1198_s21 }
 0x255   : > { %s1564_s15 = smov %s1187_s18  ;;  %16 = sbr.rel (!%p14_p8) target bundleno = 3 (0x3), region = 83 }
 0x25a   :  { %924 = vsyncpa [#allocation3], 1 }
 0x25b   :  { %926 = vsyncpa [#allocation3 + $0x1], 1 }

</bundles_post_ra>
